<compile_context>
chip_gen: v7x
topology: tpu7x:2x2x1
jax: 0.10.0
libtpu: 0.0.40
codegen_flags: <defaults>
</compile_context>

<pallas_src>
import functools

import jax
import jax.numpy as jnp
from jax.experimental import pallas as pl
from jax.experimental.pallas import tpu as pltpu

MID_LAYER_NODE_NUM = 32   # hidden width (MID_LAYER_NODE_NUM in the torch code)
LEAKY_SLOPE = 0.001       # RewardNet uses F.leaky_relu(..., 0.001)


def _leaky_relu(x, slope=LEAKY_SLOPE):
    return jnp.where(x >= 0, x, slope * x)


def rewardnet_kernel(s_ref, a_ref, w1s_ref, w1a_ref, b1_ref,
                     w2_ref, b2_ref, w3_ref, b3_ref, o_ref):
    """Fused forward for one batch tile.

    out = lrelu( sum(lrelu( lrelu(s@W1s + a@W1a + b1) @ W2 + b2 ) * w3, -1) + b3 )
    """
    # ---- Layer 1 (concat fused away: x@W1 == s@W1[:S] + a@W1[S:]) -----------
    h = (jnp.dot(s_ref[...], w1s_ref[...], preferred_element_type=jnp.float32)
         + jnp.dot(a_ref[...], w1a_ref[...], preferred_element_type=jnp.float32)
         + b1_ref[...])                                        # [TB, H] f32
    h = _leaky_relu(h)

    # ---- Layer 2 (MXU, f32 accumulate) --------------------------------------
    h = jnp.dot(h.astype(w2_ref.dtype), w2_ref[...],
                preferred_element_type=jnp.float32) + b2_ref[...]
    h = _leaky_relu(h)                                         # [TB, H] f32

    # ---- Layer 3: N=1 matmul done on VPU (mul) + XLU (lane reduce) ----------
    h = jnp.sum(h * w3_ref[...], axis=-1, keepdims=True) + b3_ref[...]  # [TB,1]
    o_ref[...] = _leaky_relu(h).astype(o_ref.dtype)


def _round_up(x, m):
    return (x + m - 1) // m * m


@functools.partial(jax.jit, static_argnames=("tb_max", "matmul_dtype"))
def reward_net_forward(s, a, params, *, tb_max=1024, matmul_dtype=jnp.float32):
    """Equivalent of RewardNet.forward((s, a))."""
    B, nb_status = s.shape
    nb_actions = a.shape[1]
    H = params["w2"].shape[0]

    # Batch tile: big enough to amortize per-step overhead, multiple of 8.
    TB = min(int(tb_max), _round_up(B, 8))
    Bp = _round_up(B, TB)
    if Bp != B:
        pad = Bp - B
        s = jnp.pad(s, ((0, pad), (0, 0)))
        a = jnp.pad(a, ((0, pad), (0, 0)))

    # Matmul operands (optionally bf16 for halved HBM traffic / native MXU rate);
    # elementwise operands stay f32.
    s_m = s.astype(matmul_dtype)
    a_m = a.astype(matmul_dtype)
    w1s = params["w1"][:nb_status].astype(matmul_dtype)   # [S, H]
    w1a = params["w1"][nb_status:].astype(matmul_dtype)   # [A, H]
    b1 = params["b1"].astype(jnp.float32)                 # [1, H]
    w2 = params["w2"].astype(matmul_dtype)                # [H, H]
    b2 = params["b2"].astype(jnp.float32)                 # [1, H]
    w3 = params["w3"].reshape(1, H).astype(jnp.float32)   # [1, H] row for VPU path
    b3 = params["b3"].reshape(1, 1).astype(jnp.float32)   # [1, 1]

    grid = (Bp // TB,)
    stream = lambda i: (i, 0)   # tiles of s / a / out advance with the grid
    resident = lambda i: (0, 0)  # weights & biases stay put in VMEM

    out = pl.pallas_call(
        rewardnet_kernel,
        out_shape=jax.ShapeDtypeStruct((Bp, 1), jnp.float32),
        grid=grid,
        in_specs=[
            pl.BlockSpec((TB, nb_status), stream),     # s
            pl.BlockSpec((TB, nb_actions), stream),    # a
            pl.BlockSpec((nb_status, H), resident),    # W1[:S]
            pl.BlockSpec((nb_actions, H), resident),   # W1[S:]
            pl.BlockSpec((1, H), resident),            # b1
            pl.BlockSpec((H, H), resident),            # W2
            pl.BlockSpec((1, H), resident),            # b2
            pl.BlockSpec((1, H), resident),            # w3 row
            pl.BlockSpec((1, 1), resident),            # b3
        ],
        out_specs=pl.BlockSpec((TB, 1), stream),
        compiler_params=pltpu.CompilerParams(
            dimension_semantics=("parallel",)),
    )(s_m, a_m, w1s, w1a, b1, w2, b2, w3, b3)

    return out[:B]


def init_params(key, nb_status, nb_actions, hidden=MID_LAYER_NODE_NUM):
    """Deterministic init mimicking torch.nn.Linear (uniform +-1/sqrt(fan_in))."""
    d_in = nb_status + nb_actions
    keys = jax.random.split(key, 6)

    def lin(kw, kb, fan_in, fan_out):
        bound = 1.0 / jnp.sqrt(jnp.asarray(fan_in, jnp.float32))
        w = jax.random.uniform(kw, (fan_in, fan_out), jnp.float32, -bound, bound)
        b = jax.random.uniform(kb, (1, fan_out), jnp.float32, -bound, bound)
        return w, b

    w1, b1 = lin(keys[0], keys[1], d_in, hidden)
    w2, b2 = lin(keys[2], keys[3], hidden, hidden)
    w3, b3 = lin(keys[4], keys[5], hidden, 1)
    return dict(w1=w1, b1=b1, w2=w2, b2=b2, w3=w3, b3=b3)


def reward_net_reference(s, a, params):
    """Plain-JAX reference for correctness checking."""
    x = jnp.concatenate([s, a], axis=1).astype(jnp.float32)
    h = _leaky_relu(x @ params["w1"] + params["b1"])
    h = _leaky_relu(h @ params["w2"] + params["b2"])
    h = _leaky_relu(h @ params["w3"] + params["b3"])
    return h


if __name__ == "__main__":
    key = jax.random.PRNGKey(0)
    k_s, k_a, k_p = jax.random.split(key, 3)

    batch, nb_status, nb_actions = 8, 16, 16
    s = jax.random.normal(k_s, (batch, nb_status), jnp.float32)
    a = jax.random.normal(k_a, (batch, nb_actions), jnp.float32)
    params = init_params(k_p, nb_status, nb_actions)

    # f32 path, single tile.
    out = jax.block_until_ready(reward_net_forward(s, a, params))
    ref = reward_net_reference(s, a, params)
    assert out.shape == (batch, 1), out.shape
    assert jnp.allclose(out, ref, atol=1e-4, rtol=1e-4), (out, ref)

    # Multi-tile grid + batch padding path (B not a multiple of the tile).
    batch2 = 13
    s2 = jax.random.normal(jax.random.PRNGKey(1), (batch2, nb_status), jnp.float32)
    a2 = jax.random.normal(jax.random.PRNGKey(2), (batch2, nb_actions), jnp.float32)
    out2 = jax.block_until_ready(
        reward_net_forward(s2, a2, params, tb_max=8))   # TB=8 -> pad to 16, grid=(2,)
    ref2 = reward_net_reference(s2, a2, params)
    assert out2.shape == (batch2, 1), out2.shape
    assert jnp.allclose(out2, ref2, atol=1e-4, rtol=1e-4), (out2, ref2)

    # bf16-matmul-input path (v6e/v7x optimization), relaxed tolerance.
    out_bf16 = jax.block_until_ready(
        reward_net_forward(s, a, params, matmul_dtype=jnp.bfloat16))
    assert out_bf16.shape == (batch, 1), out_bf16.shape
    assert jnp.allclose(out_bf16, ref, atol=5e-2, rtol=5e-2), (out_bf16, ref)

    print("KERNEL_OK")
</pallas_src>

<mosaic_0001>
module attributes {stable_mosaic.version = 11 : i64} {
  func.func @rewardnet_kernel(%arg0: i32, %arg1: memref<8x16xf32, #tpu.memory_space<vmem>>, %arg2: memref<8x16xf32, #tpu.memory_space<vmem>>, %arg3: memref<16x32xf32, #tpu.memory_space<vmem>>, %arg4: memref<16x32xf32, #tpu.memory_space<vmem>>, %arg5: memref<1x32xf32, #tpu.memory_space<vmem>>, %arg6: memref<32x32xf32, #tpu.memory_space<vmem>>, %arg7: memref<1x32xf32, #tpu.memory_space<vmem>>, %arg8: memref<1x32xf32, #tpu.memory_space<vmem>>, %arg9: memref<1x1xf32, #tpu.memory_space<vmem>>, %arg10: memref<8x1xf32, #tpu.memory_space<vmem>>) attributes {dimension_semantics = [#tpu.dimension_semantics<parallel>], iteration_bounds = array<i64: 1>, scalar_prefetch = 0 : i64, scratch_operands = 0 : i64, tpu.core_type = #tpu.core_type<tc>, window_params = [{transform_indices = @transform_0, window_bounds = array<i64: 8, 16>}, {transform_indices = @transform_1, window_bounds = array<i64: 8, 16>}, {pipeline_mode = #tpu.pipeline_mode<synchronous>, transform_indices = @transform_2, window_bounds = array<i64: 16, 32>}, {pipeline_mode = #tpu.pipeline_mode<synchronous>, transform_indices = @transform_3, window_bounds = array<i64: 16, 32>}, {pipeline_mode = #tpu.pipeline_mode<synchronous>, transform_indices = @transform_4, window_bounds = array<i64: 1, 32>}, {pipeline_mode = #tpu.pipeline_mode<synchronous>, transform_indices = @transform_5, window_bounds = array<i64: 32, 32>}, {pipeline_mode = #tpu.pipeline_mode<synchronous>, transform_indices = @transform_6, window_bounds = array<i64: 1, 32>}, {pipeline_mode = #tpu.pipeline_mode<synchronous>, transform_indices = @transform_7, window_bounds = array<i64: 1, 32>}, {pipeline_mode = #tpu.pipeline_mode<synchronous>, transform_indices = @transform_8, window_bounds = array<i64: 1, 1>}, {transform_indices = @transform_9, window_bounds = array<i64: 8, 1>}]} {
    %c0 = arith.constant 0 : index
    %c0_0 = arith.constant 0 : index
    %0 = vector.load %arg1[%c0, %c0_0] : memref<8x16xf32, #tpu.memory_space<vmem>>, vector<8x16xf32>
    %c0_1 = arith.constant 0 : index
    %c0_2 = arith.constant 0 : index
    %1 = vector.load %arg3[%c0_1, %c0_2] : memref<16x32xf32, #tpu.memory_space<vmem>>, vector<16x32xf32>
    %cst = arith.constant dense<0.000000e+00> : vector<8x32xf32>
    %2 = tpu.matmul %0, %1, %cst {dimension_numbers = #tpu.dot_dimension_numbers<[1], [0], [0], [1], [0, 0, 1, 1], [], []>} : vector<8x16xf32>, vector<16x32xf32>, vector<8x32xf32> -> vector<8x32xf32>
    %c0_3 = arith.constant 0 : index
    %c0_4 = arith.constant 0 : index
    %3 = vector.load %arg2[%c0_3, %c0_4] : memref<8x16xf32, #tpu.memory_space<vmem>>, vector<8x16xf32>
    %c0_5 = arith.constant 0 : index
    %c0_6 = arith.constant 0 : index
    %4 = vector.load %arg4[%c0_5, %c0_6] : memref<16x32xf32, #tpu.memory_space<vmem>>, vector<16x32xf32>
    %cst_7 = arith.constant dense<0.000000e+00> : vector<8x32xf32>
    %5 = tpu.matmul %3, %4, %cst_7 {dimension_numbers = #tpu.dot_dimension_numbers<[1], [0], [0], [1], [0, 0, 1, 1], [], []>} : vector<8x16xf32>, vector<16x32xf32>, vector<8x32xf32> -> vector<8x32xf32>
    %6 = arith.addf %2, %5 : vector<8x32xf32>
    %c0_8 = arith.constant 0 : index
    %c0_9 = arith.constant 0 : index
    %7 = vector.load %arg5[%c0_8, %c0_9] : memref<1x32xf32, #tpu.memory_space<vmem>>, vector<1x32xf32>
    %8 = vector.broadcast %7 : vector<1x32xf32> to vector<8x32xf32>
    %9 = arith.addf %6, %8 : vector<8x32xf32>
    %cst_10 = arith.constant 0.000000e+00 : f32
    %10 = vector.broadcast %cst_10 : f32 to vector<8x32xf32>
    %11 = arith.cmpf oge, %9, %10 : vector<8x32xf32>
    %cst_11 = arith.constant 1.000000e-03 : f32
    %12 = vector.broadcast %cst_11 : f32 to vector<8x32xf32>
    %13 = arith.mulf %12, %9 : vector<8x32xf32>
    %14 = arith.select %11, %9, %13 : vector<8x32xi1>, vector<8x32xf32>
    %c0_12 = arith.constant 0 : index
    %c0_13 = arith.constant 0 : index
    %15 = vector.load %arg6[%c0_12, %c0_13] : memref<32x32xf32, #tpu.memory_space<vmem>>, vector<32x32xf32>
    %cst_14 = arith.constant dense<0.000000e+00> : vector<8x32xf32>
    %16 = tpu.matmul %14, %15, %cst_14 {dimension_numbers = #tpu.dot_dimension_numbers<[1], [0], [0], [1], [0, 0, 1, 1], [], []>} : vector<8x32xf32>, vector<32x32xf32>, vector<8x32xf32> -> vector<8x32xf32>
    %c0_15 = arith.constant 0 : index
    %c0_16 = arith.constant 0 : index
    %17 = vector.load %arg7[%c0_15, %c0_16] : memref<1x32xf32, #tpu.memory_space<vmem>>, vector<1x32xf32>
    %18 = vector.broadcast %17 : vector<1x32xf32> to vector<8x32xf32>
    %19 = arith.addf %16, %18 : vector<8x32xf32>
    %cst_17 = arith.constant 0.000000e+00 : f32
    %20 = vector.broadcast %cst_17 : f32 to vector<8x32xf32>
    %21 = arith.cmpf oge, %19, %20 : vector<8x32xf32>
    %cst_18 = arith.constant 1.000000e-03 : f32
    %22 = vector.broadcast %cst_18 : f32 to vector<8x32xf32>
    %23 = arith.mulf %22, %19 : vector<8x32xf32>
    %24 = arith.select %21, %19, %23 : vector<8x32xi1>, vector<8x32xf32>
    %c0_19 = arith.constant 0 : index
    %c0_20 = arith.constant 0 : index
    %25 = vector.load %arg8[%c0_19, %c0_20] : memref<1x32xf32, #tpu.memory_space<vmem>>, vector<1x32xf32>
    %26 = vector.broadcast %25 : vector<1x32xf32> to vector<8x32xf32>
    %27 = arith.mulf %24, %26 : vector<8x32xf32>
    %cst_21 = arith.constant dense<0.000000e+00> : vector<8xf32>
    %28 = vector.multi_reduction <add>, %27, %cst_21 [1] : vector<8x32xf32> to vector<8xf32>
    %29 = vector.shape_cast %28 : vector<8xf32> to vector<8x1xf32>
    %c0_22 = arith.constant 0 : index
    %c0_23 = arith.constant 0 : index
    %30 = vector.load %arg9[%c0_22, %c0_23] : memref<1x1xf32, #tpu.memory_space<vmem>>, vector<1x1xf32>
    %31 = vector.broadcast %30 : vector<1x1xf32> to vector<8x1xf32>
    %32 = arith.addf %29, %31 : vector<8x1xf32>
    %cst_24 = arith.constant 0.000000e+00 : f32
    %33 = vector.broadcast %cst_24 : f32 to vector<8x1xf32>
    %34 = arith.cmpf oge, %32, %33 : vector<8x1xf32>
    %cst_25 = arith.constant 1.000000e-03 : f32
    %35 = vector.broadcast %cst_25 : f32 to vector<8x1xf32>
    %36 = arith.mulf %35, %32 : vector<8x1xf32>
    %37 = arith.select %34, %32, %36 : vector<8x1xi1>, vector<8x1xf32>
    %c0_26 = arith.constant 0 : index
    %c0_27 = arith.constant 0 : index
    %38 = vector.load %arg10[%c0_26, %c0_27] : memref<8x1xf32, #tpu.memory_space<vmem>>, vector<8x1xf32>
    tpu.vector_store %arg10[%c0_26, %c0_27], %37 {strides = array<i32>} : memref<8x1xf32, #tpu.memory_space<vmem>>, vector<8x1xf32>,
    return
  }
  func.func @transform_0(%arg0: i32) -> (i32, i32) {
    %c0_i32 = arith.constant 0 : i32
    %c0_i32_0 = arith.constant 0 : i32
    return %arg0, %c0_i32 : i32, i32
  }
  func.func @transform_1(%arg0: i32) -> (i32, i32) {
    %c0_i32 = arith.constant 0 : i32
    %c0_i32_0 = arith.constant 0 : i32
    return %arg0, %c0_i32 : i32, i32
  }
  func.func @transform_2(%arg0: i32) -> (i32, i32) {
    %c0_i32 = arith.constant 0 : i32
    %c0_i32_0 = arith.constant 0 : i32
    %c0_i32_1 = arith.constant 0 : i32
    return %c0_i32, %c0_i32_0 : i32, i32
  }
  func.func @transform_3(%arg0: i32) -> (i32, i32) {
    %c0_i32 = arith.constant 0 : i32
    %c0_i32_0 = arith.constant 0 : i32
    %c0_i32_1 = arith.constant 0 : i32
    return %c0_i32, %c0_i32_0 : i32, i32
  }
  func.func @transform_4(%arg0: i32) -> (i32, i32) {
    %c0_i32 = arith.constant 0 : i32
    %c0_i32_0 = arith.constant 0 : i32
    %c0_i32_1 = arith.constant 0 : i32
    return %c0_i32, %c0_i32_0 : i32, i32
  }
  func.func @transform_5(%arg0: i32) -> (i32, i32) {
    %c0_i32 = arith.constant 0 : i32
    %c0_i32_0 = arith.constant 0 : i32
    %c0_i32_1 = arith.constant 0 : i32
    return %c0_i32, %c0_i32_0 : i32, i32
  }
  func.func @transform_6(%arg0: i32) -> (i32, i32) {
    %c0_i32 = arith.constant 0 : i32
    %c0_i32_0 = arith.constant 0 : i32
    %c0_i32_1 = arith.constant 0 : i32
    return %c0_i32, %c0_i32_0 : i32, i32
  }
  func.func @transform_7(%arg0: i32) -> (i32, i32) {
    %c0_i32 = arith.constant 0 : i32
    %c0_i32_0 = arith.constant 0 : i32
    %c0_i32_1 = arith.constant 0 : i32
    return %c0_i32, %c0_i32_0 : i32, i32
  }
  func.func @transform_8(%arg0: i32) -> (i32, i32) {
    %c0_i32 = arith.constant 0 : i32
    %c0_i32_0 = arith.constant 0 : i32
    %c0_i32_1 = arith.constant 0 : i32
    return %c0_i32, %c0_i32_0 : i32, i32
  }
  func.func @transform_9(%arg0: i32) -> (i32, i32) {
    %c0_i32 = arith.constant 0 : i32
    %c0_i32_0 = arith.constant 0 : i32
    return %arg0, %c0_i32 : i32, i32
  }
}

</mosaic_0001>

<bundles_post_ra>
// kernel: reward_net_forward.1
= control target key start
LH: loop header
LB: loop body
LE: loop exit
PB: predicated region body
PF: predicated region fallthrough
CT: control target
= control target key end

     0   :  { %v372_v0 = vmov 0.0|0.0   ;;  %vm373_vm0 = vmmov 0   ;;  %v374_v3 = vmov 0.0   ;;  %vm40_vm1 = vcmask 130048   ;;  %s475_s3 = inlined_call_operand.vmem [shape: f32[16,32], index: 3, kind: input, shape index: {}]   ;;  %s476_s2 = inlined_call_operand.vmem [shape: f32[16,32], index: 2, kind: input, shape index: {}]   ;;  %s477_s1 = inlined_call_operand.vmem [shape: f32[8,16], index: 1, kind: input, shape index: {}]   ;;  %s478_s0 = inlined_call_operand.vmem [shape: f32[8,16], index: 0, kind: input, shape index: {}]   ;;  %s479_s5 = inlined_call_operand.vmem [shape: f32[32,32], index: 5, kind: input, shape index: {}]   ;;  %s480_s4 = inlined_call_operand.vmem [shape: f32[1,32], index: 4, kind: input, shape index: {}]   ;;  %s481_s8 = inlined_call_operand.<no memory space> [shape: f32[1,1], index: 8, kind: input, shape index: {}]   ;;  %s482_s6 = inlined_call_operand.vmem [shape: f32[1,32], index: 6, kind: input, shape index: {}]   ;;  %s483_s7 = inlined_call_operand.vmem [shape: f32[1,32], index: 7, kind: input, shape index: {}]   ;;  %s484_s9 = inlined_call_operand.vmem [shape: f32[8,1], index: 9, kind: output, shape index: {}]  }
   0x1   :  { %357 = vmatprep.subr.bf16.mxu1 %v372_v0  ;;  %v38_v1 = vld [vmem:[%s475_s3] sm:$0xff]  ;;  %v39_v2 = vld [vmem:[%s475_s3 + $0x8] sm:$0xff]  ;;  %336 = vmatprep.mubr.msk.f32.mxu1 %vm373_vm0, %v374_v3  ;;  %v200_v13 = vld [vmem:[%s479_s5 + $0x10] sm:$0xff]  ;;  %vm209_vm3 = vcmask 261120   ;;  %v14_v25 = vstv %s481_s8  ;;  %vm308_vm6 = vcmask 7168  }
   0x2   :  { %v358_v4 = vpack.c.bf16 %v39_v2, %v38_v1  ;;  %v35_v5 = vld [vmem:[%s476_s2] sm:$0xff]  ;;  %v36_v6 = vld [vmem:[%s476_s2 + $0x8] sm:$0xff]  ;;  %363 = vmatprep.subr.bf16.mxu0 %v372_v0  ;;  %354 = vmatprep.mubr.msk.f32.mxu0 %vm373_vm0, %v374_v3  ;;  %v201_v14 = vld [vmem:[%s479_s5 + $0x18] sm:$0xff]  ;;  %15 = vst [vmem:[#allocation2] sm:$0x1] %v14_v25 }
   0x3   :  { %v37_v7 = vld [vmem:[%s477_s1] sm:$0xff]  ;;  %v361_v8 = vpack.c.bf16 %v36_v6, %v35_v5  ;;  %v199_v11 = vld [vmem:[%s479_s5 + $0x8] sm:$0xff]  ;;  %v367_v15 = vpack.c.bf16 %v201_v14, %v200_v13 }
   0x4   :  { %359 = vmatpush3.bf16.msra.mxu1 %v358_v4  ;;  %v34_v9 = vld [vmem:[%s478_s0] sm:$0xff] }
   0x5   :  { %360 = vmatprep.subr.bf16.mxu1 %v372_v0  ;;  %v198_v10 = vld [vmem:[%s479_s5] sm:$0xff] }
   0x6   :  { %v364_v12 = vpack.c.bf16 %v199_v11, %v198_v10  ;;  %v316_v19 = vld [vmem:[%s480_s4] ss:$0 sm:$0xff] }
   0x7   :  { %337 = vmatmul.mubr.msk.f32.vlgmr.msra.gmra.mrb[0].mxu1 %vm40_vm1, %v37_v7  ;;  %v317_v26 = vld [vmem:[%s482_s6] ss:$0 sm:$0xff] }
   0x8   :  { %362 = vmatpush3.bf16.msra.mxu1 %v361_v8  ;;  %343 = vmatprep.mubr.msk.f32.mxu1 %vm373_vm0, %v374_v3  ;;  %v319_v31 = vld [vmem:[%s483_s7] ss:$0 sm:$0xff] }
   0x9   :  { %365 = vmatpush3.bf16.msra.mxu0 %v364_v12  ;;  %v320_v35 = vld [vmem:[#allocation2] ss:$0 sm:$0xff] }
   0xa   :  { %366 = vmatprep.subr.bf16.mxu0 %v372_v0 }
   0xb   :  { %344 = vmatmul.mubr.msk.f32.vlgmr.msra.gmra.mrb[2].mxu1 %vm40_vm1, %v34_v9 }
   0xd   :  { %368 = vmatpush3.bf16.msra.mxu0 %v367_v15 }
  0xda   :  { %v110_v16 = vpop.f32.mrb[0].mxu1 }
  0xdb   :  { %v338_v17 = vpop.f32.mrb[1].mxu1 }
  0xde   :  { %v183_v18 = vpop.f32.mrb[2].mxu1 }
  0xdf   :  { %v184_v20 = vadd.f32 %v183_v18, %v110_v16  ;;  %v345_v21 = vpop.f32.mrb[3].mxu1 }
  0xe1   :  { %v194_v22 = vadd.f32 %v316_v19, %v184_v20 }
  0xe3   :  { %v196_v23 = vmul.f32 0.001, %v194_v22  ;;  %vm195_vm2 = vcmp.ge.f32.partialorder %v194_v22, 0.0 }
  0xe5   :  { %v197_v24 = vsel %vm195_vm2, %v194_v22, %v196_v23 }
  0xe6   :  { %355 = vmatmul.mubr.msk.f32.vlgmr.msra.gmra.mrb[0].mxu0 %vm209_vm3, %v197_v24 }
 0x1b9   :  { %v279_v27 = vpop.f32.mrb[0].mxu0 }
 0x1ba   :  { %v280_v28 = vadd.f32 %v317_v26, %v279_v27  ;;  %v356_v29 = vpop.f32.mrb[1].mxu0 }
 0x1bc   :  { %v284_v30 = vmul.f32 0.001, %v280_v28  ;;  %vm283_vm4 = vcmp.ge.f32.partialorder %v280_v28, 0.0 }
 0x1be   :  { %v285_v32 = vsel %vm283_vm4, %v280_v28, %v284_v30 }
 0x1bf   :  { %v293_v33 = vmul.f32 %v319_v31, %v285_v32 }
 0x1c1   :  { %v294_v34 = vsel %vm209_vm3, %v293_v33, 0.0 }
 0x1c2   :  { %295 = vadd.xlane.f32.xlu0 %v294_v34 }
 0x24f   :  { %v296_v36 = vpop.xlane.xlu0 %295 }
 0x250   :  { %v304_v37 = vadd.f32 %v320_v35, %v296_v36 }
 0x252   :  { %vm305_vm5 = vcmp.ge.f32.partialorder %v304_v37, 0.0  ;;  %v306_v38 = vmul.f32 0.001, %v304_v37 }
 0x254   :  { %v307_v39 = vsel %vm305_vm5, %v304_v37, %v306_v38 }
 0x255   :  { %309 = vst.msk [vmem:[%s484_s9] sm:$0xff] %vm308_vm6, %v307_v39 }

</bundles_post_ra>
